<compile_context>
chip_gen: v7x
topology: tpu7x:2x2x1
jax: 0.10.0
libtpu: 0.0.40
codegen_flags: <defaults>
</compile_context>

<pallas_src>
import functools

import numpy as np
import jax
import jax.numpy as jnp
from jax.experimental import pallas as pl
from jax.experimental.pallas import tpu as pltpu

EPS = 1e-8                       # `epsilon` in the reference module
_DFT_DTYPE = jnp.bfloat16        # MXU operand dtype for the DFT stage (f32 accumulate)


# --------------------------------------------------------------------------- utils
def _vmem_budget_bytes():
    """Device-aware VMEM limit (review: don't hard-code 48 MiB)."""
    try:
        cap = int(pltpu.get_tpu_info().vmem_capacity_bytes)
    except Exception:
        cap = 64 * 1024 * 1024           # conservative: v7x physical VMEM per TC
    return min(cap * 3 // 4, 112 * 1024 * 1024)


def _pick_hw_tile(hw, m, nbp):
    """Largest 128-multiple divisor of HW whose double-buffered blocks fit the budget."""
    if hw % 128 != 0:
        return hw                         # block == full dim is always legal
    budget = _vmem_budget_bytes() // 2    # headroom for residents / scratch / output
    best = 128
    t = 128
    while t <= hw:
        if hw % t == 0 and 2 * (t * nbp * 4 + m * t * 4) <= budget:
            best = t
        t += 128
    return best


def _rgb2gray(x):
    # x: (N, C, H, W)
    if x.shape[1] == 3:
        return 0.2989 * x[:, 0] + 0.587 * x[:, 1] + 0.114 * x[:, 2]
    if x.shape[1] == 1:
        return x[:, 0]
    raise ValueError("channel dim must be 1 or 3")


# --------------------------------------------------------------------------- kernels
def _dft_mag_kernel(x_ref, kh_ref, kwc_ref, kws_ref, mag_ref):
    """Per-image separable 2-D DFT + log-magnitude (unshifted spectrum).

    x:   (1, H, W)  gray image block for image m
    kh:  (2H, H)    stacked height-DFT weights [Ch; Sh], bf16
    kwc: (W, W)     width-DFT cosine weights Cw, bf16
    kws: (W, W)     width-DFT sine   weights Sw, bf16
    mag: (1, H, W)  log(sqrt(Re^2 + Im^2) + eps) output, f32
    """
    H = x_ref.shape[1]
    x = x_ref[0].astype(_DFT_DTYPE)                                      # (H, W)

    # height DFT, both halves in one MXU pass: t[:H] = Ch@X, t[H:] = Sh@X
    t = jnp.dot(kh_ref[...], x, preferred_element_type=jnp.float32)      # (2H, W)
    tb = t.astype(_DFT_DTYPE)

    # width DFT
    qc = jnp.dot(tb, kwc_ref[...], preferred_element_type=jnp.float32)   # [A@Cw; B@Cw]
    qs = jnp.dot(tb, kws_ref[...], preferred_element_type=jnp.float32)   # [A@Sw; B@Sw]

    fre = qc[:H, :] - qs[H:, :] + EPS        # Re(F) = Ch X Cw - Sh X Sw   (+eps, as ref)
    fim = -(qs[:H, :] + qc[H:, :]) + EPS     # Im(F) = -(Ch X Sw + Sh X Cw)
    mag_ref[0] = jnp.log(jnp.sqrt(fre * fre + fim * fim) + EPS)


def _bin_loss_kernel(mag_ref, binw_ref, loss_ref, rp_acc, *, n_img, n_bins):
    """fftshift-baked radial binning + min-max norm + MSE.

    mag:   (2N, thw)   column block of flattened log-magnitude spectra
    binw:  (thw, NBp)  one-hot radial bins (shift baked in) / (count + 1e-10), 0-padded
    loss:  (1, 1)      scalar MSE
    rp_acc:(2N, NBp)   radial-profile accumulator (VMEM scratch)
    """
    j = pl.program_id(0)

    @pl.when(j == 0)
    def _init():
        rp_acc[...] = jnp.zeros_like(rp_acc)

    rp_acc[...] += jnp.dot(mag_ref[...], binw_ref[...],
                           preferred_element_type=jnp.float32)

    @pl.when(j == pl.num_programs(0) - 1)
    def _finalize():
        rp = rp_acc[...]                                                  # (2N, NBp)
        col = jax.lax.broadcasted_iota(jnp.int32, rp.shape, 1)
        valid = col < n_bins                                              # exclude pad bins
        mn = jnp.min(jnp.where(valid, rp, jnp.inf), axis=1, keepdims=True)
        mx = jnp.max(jnp.where(valid, rp, -jnp.inf), axis=1, keepdims=True)
        prof = (rp - mn) / (mx - mn)        # NaN if flat profile — same as reference
        diff = prof[:n_img, :] - prof[n_img:, :]                          # (N, NBp)
        diff = jnp.where(valid[:n_img, :], diff, 0.0)
        loss_ref[...] = (jnp.sum(diff * diff, axis=(0, 1), keepdims=True)
                         * (1.0 / float(n_img * n_bins)))


# --------------------------------------------------------------------------- host setup
def _make_constants(H, W):
    HW = H * W

    # Separable DFT weights.
    h = np.arange(H, dtype=np.float64)
    w = np.arange(W, dtype=np.float64)
    th = 2.0 * np.pi * np.outer(h, h) / float(H)        # th[u, h] = 2*pi*u*h/H
    tw = 2.0 * np.pi * np.outer(w, w) / float(W)        # tw[w, v] = 2*pi*v*w/W
    kh = np.concatenate([np.cos(th), np.sin(th)], axis=0)   # (2H, H): [Ch; Sh]
    kwc = np.cos(tw)                                          # (W, W)
    kws = np.sin(tw)                                          # (W, W)

    # Radial bin of each pixel of the SHIFTED spectrum.  The reference hard-codes the
    # centre as 10/2 == 5 regardless of H/W (replicated) and truncates to int.
    ii = np.arange(H, dtype=np.float64)[:, None]
    jj = np.arange(W, dtype=np.float64)[None, :]
    rb = np.sqrt((jj - 5.0) ** 2 + (ii - 5.0) ** 2).astype(np.int32)
    nb = int(rb.max()) + 1
    cnt = np.bincount(rb.reshape(-1), minlength=nb).astype(np.float64)

    # Bake the fftshift into the bin of each UNSHIFTED spectrum pixel, fold the
    # 1/(count + 1e-10) normalisation into the one-hot columns, pad bins to 128-multiple.
    rb_unshift = np.roll(rb, shift=(-(H // 2), -(W // 2)), axis=(0, 1))
    nbp = ((nb + 127) // 128) * 128
    onehot = (rb_unshift.reshape(-1)[:, None] == np.arange(nbp)[None, :]).astype(np.float64)
    cntp = np.concatenate([cnt, np.ones(nbp - nb, np.float64)])
    binw = (onehot / (cntp[None, :] + 1e-10)).astype(np.float32)          # (HW, NBp)

    return kh, kwc, kws, binw, nb, nbp


@functools.lru_cache(maxsize=None)
def _build_psd_loss_fn(N, H, W):
    HW = H * W
    M = 2 * N
    kh_np, kwc_np, kws_np, binw_np, nb, nbp = _make_constants(H, W)
    kh = jnp.asarray(kh_np).astype(_DFT_DTYPE)
    kwc = jnp.asarray(kwc_np).astype(_DFT_DTYPE)
    kws = jnp.asarray(kws_np).astype(_DFT_DTYPE)
    binw = jnp.asarray(binw_np)

    vmem_limit = _vmem_budget_bytes()

    # kernel A: per-image separable DFT + log magnitude; batch axis is "parallel"
    # (v7x megacore splits the images across its two TensorCores).
    dft_call = pl.pallas_call(
        _dft_mag_kernel,
        out_shape=jax.ShapeDtypeStruct((M, H, W), jnp.float32),
        grid_spec=pltpu.PrefetchScalarGridSpec(
            num_scalar_prefetch=0,
            grid=(M,),
            in_specs=[
                pl.BlockSpec((1, H, W), lambda m: (m, 0, 0)),     # one gray image
                pl.BlockSpec((2 * H, H), lambda m: (0, 0)),       # [Ch; Sh]
                pl.BlockSpec((W, W), lambda m: (0, 0)),           # Cw
                pl.BlockSpec((W, W), lambda m: (0, 0)),           # Sw
            ],
            out_specs=pl.BlockSpec((1, H, W), lambda m: (m, 0, 0)),
        ),
        compiler_params=pltpu.CompilerParams(
            dimension_semantics=("parallel",),
            vmem_limit_bytes=vmem_limit,
        ),
    )

    # kernel B: radial binning matmul (HW-tiled reduction) + normalise + MSE.
    thw = _pick_hw_tile(HW, M, nbp)
    nblk = HW // thw
    bin_call = pl.pallas_call(
        functools.partial(_bin_loss_kernel, n_img=N, n_bins=nb),
        out_shape=jax.ShapeDtypeStruct((1, 1), jnp.float32),
        grid_spec=pltpu.PrefetchScalarGridSpec(
            num_scalar_prefetch=0,
            grid=(nblk,),
            in_specs=[
                pl.BlockSpec((M, thw), lambda j: (0, j)),         # flattened spectra
                pl.BlockSpec((thw, nbp), lambda j: (j, 0)),       # matching bin rows
            ],
            out_specs=pl.BlockSpec((1, 1), lambda j: (0, 0)),
            scratch_shapes=[pltpu.VMEM((M, nbp), jnp.float32)],
        ),
        compiler_params=pltpu.CompilerParams(
            dimension_semantics=("arbitrary",),                    # reduction axis
            vmem_limit_bytes=vmem_limit,
        ),
    )

    def fn(pred, target, kh, kwc, kws, binw):
        gp = _rgb2gray(pred.astype(jnp.float32))           # (N, H, W)
        gt = _rgb2gray(target.astype(jnp.float32))
        g = jnp.concatenate([gp, gt], axis=0)              # (2N, H, W): pred then target
        mag = dft_call(g, kh, kwc, kws)                    # (2N, H, W) log-magnitudes
        loss = bin_call(mag.reshape(M, HW), binw)          # host reshape (free in XLA)
        return loss[0, 0]

    jitted = jax.jit(fn)
    return lambda pred, target: jitted(pred, target, kh, kwc, kws, binw)


def psd_loss2(pred, target):
    """JAX/Pallas equivalent of PSDLoss2.forward. pred/target: (N, C, H, W)."""
    N, C, H, W = pred.shape
    assert H == W, "reference azimuthalAverage assumes square spatial dims"
    assert H % 2 == 0 and W % 2 == 0, "reference shift() assumes even spatial dims"
    # TODO(synk): reference returns `.to(device)` with an undefined `device`; dropped.
    return _build_psd_loss_fn(N, H, W)(pred, target)


if __name__ == "__main__":
    key = jax.random.PRNGKey(0)
    k1, k2 = jax.random.split(key)
    N, C, H, W = 2, 3, 16, 16
    pred = jax.random.uniform(k1, (N, C, H, W), dtype=jnp.float32)
    target = jax.random.uniform(k2, (N, C, H, W), dtype=jnp.float32)

    loss = psd_loss2(pred, target)
    jax.block_until_ready(loss)
    assert bool(jnp.isfinite(loss))
    print("KERNEL_OK")
</pallas_src>

<mosaic_0001>
module attributes {stable_mosaic.version = 11 : i64} {
  func.func @_dft_mag_kernel(%arg0: i32, %arg1: memref<1x16x16xf32, #tpu.memory_space<vmem>>, %arg2: memref<32x16xbf16, #tpu.memory_space<vmem>>, %arg3: memref<16x16xbf16, #tpu.memory_space<vmem>>, %arg4: memref<16x16xbf16, #tpu.memory_space<vmem>>, %arg5: memref<1x16x16xf32, #tpu.memory_space<vmem>>) attributes {dimension_semantics = [#tpu.dimension_semantics<parallel>], iteration_bounds = array<i64: 4>, scalar_prefetch = 0 : i64, scratch_operands = 0 : i64, tpu.core_type = #tpu.core_type<tc>, window_params = [{transform_indices = @transform_0, window_bounds = array<i64: 1, 16, 16>}, {pipeline_mode = #tpu.pipeline_mode<synchronous>, transform_indices = @transform_1, window_bounds = array<i64: 32, 16>}, {pipeline_mode = #tpu.pipeline_mode<synchronous>, transform_indices = @transform_2, window_bounds = array<i64: 16, 16>}, {pipeline_mode = #tpu.pipeline_mode<synchronous>, transform_indices = @transform_3, window_bounds = array<i64: 16, 16>}, {transform_indices = @transform_4, window_bounds = array<i64: 1, 16, 16>}]} {
    %c0 = arith.constant 0 : index
    %c0_0 = arith.constant 0 : index
    %c0_1 = arith.constant 0 : index
    %0 = vector.load %arg1[%c0, %c0_0, %c0_1] : memref<1x16x16xf32, #tpu.memory_space<vmem>>, vector<1x16x16xf32>
    %1 = vector.shape_cast %0 : vector<1x16x16xf32> to vector<16x16xf32>
    %2 = arith.truncf %1 : vector<16x16xf32> to vector<16x16xbf16>
    %c0_2 = arith.constant 0 : index
    %c0_3 = arith.constant 0 : index
    %3 = vector.load %arg2[%c0_2, %c0_3] : memref<32x16xbf16, #tpu.memory_space<vmem>>, vector<32x16xbf16>
    %cst = arith.constant dense<0.000000e+00> : vector<32x16xf32>
    %4 = tpu.matmul %3, %2, %cst {dimension_numbers = #tpu.dot_dimension_numbers<[1], [0], [0], [1], [0, 0, 1, 1], [], []>} : vector<32x16xbf16>, vector<16x16xbf16>, vector<32x16xf32> -> vector<32x16xf32>
    %5 = arith.truncf %4 : vector<32x16xf32> to vector<32x16xbf16>
    %c0_4 = arith.constant 0 : index
    %c0_5 = arith.constant 0 : index
    %6 = vector.load %arg3[%c0_4, %c0_5] : memref<16x16xbf16, #tpu.memory_space<vmem>>, vector<16x16xbf16>
    %cst_6 = arith.constant dense<0.000000e+00> : vector<32x16xf32>
    %7 = tpu.matmul %5, %6, %cst_6 {dimension_numbers = #tpu.dot_dimension_numbers<[1], [0], [0], [1], [0, 0, 1, 1], [], []>} : vector<32x16xbf16>, vector<16x16xbf16>, vector<32x16xf32> -> vector<32x16xf32>
    %c0_7 = arith.constant 0 : index
    %c0_8 = arith.constant 0 : index
    %8 = vector.load %arg4[%c0_7, %c0_8] : memref<16x16xbf16, #tpu.memory_space<vmem>>, vector<16x16xbf16>
    %cst_9 = arith.constant dense<0.000000e+00> : vector<32x16xf32>
    %9 = tpu.matmul %5, %8, %cst_9 {dimension_numbers = #tpu.dot_dimension_numbers<[1], [0], [0], [1], [0, 0, 1, 1], [], []>} : vector<32x16xbf16>, vector<16x16xbf16>, vector<32x16xf32> -> vector<32x16xf32>
    %10 = vector.extract_strided_slice %7 {offsets = [0, 0], sizes = [16, 16], strides = [1, 1]} : vector<32x16xf32> to vector<16x16xf32>
    %11 = vector.extract_strided_slice %9 {offsets = [16, 0], sizes = [16, 16], strides = [1, 1]} : vector<32x16xf32> to vector<16x16xf32>
    %12 = arith.subf %10, %11 : vector<16x16xf32>
    %cst_10 = arith.constant 9.99999993E-9 : f32
    %13 = vector.broadcast %cst_10 : f32 to vector<16x16xf32>
    %14 = arith.addf %12, %13 : vector<16x16xf32>
    %15 = vector.extract_strided_slice %9 {offsets = [0, 0], sizes = [16, 16], strides = [1, 1]} : vector<32x16xf32> to vector<16x16xf32>
    %16 = vector.extract_strided_slice %7 {offsets = [16, 0], sizes = [16, 16], strides = [1, 1]} : vector<32x16xf32> to vector<16x16xf32>
    %17 = arith.addf %15, %16 : vector<16x16xf32>
    %cst_11 = arith.constant 0.000000e+00 : f32
    %18 = vector.broadcast %cst_11 : f32 to vector<16x16xf32>
    %19 = arith.subf %18, %17 : vector<16x16xf32>
    %cst_12 = arith.constant 9.99999993E-9 : f32
    %20 = vector.broadcast %cst_12 : f32 to vector<16x16xf32>
    %21 = arith.addf %19, %20 : vector<16x16xf32>
    %22 = arith.mulf %14, %14 : vector<16x16xf32>
    %23 = arith.mulf %21, %21 : vector<16x16xf32>
    %24 = arith.addf %22, %23 : vector<16x16xf32>
    %25 = math.sqrt %24 : vector<16x16xf32>
    %cst_13 = arith.constant 9.99999993E-9 : f32
    %26 = vector.broadcast %cst_13 : f32 to vector<16x16xf32>
    %27 = arith.addf %25, %26 : vector<16x16xf32>
    %28 = math.log %27 : vector<16x16xf32>
    %c0_14 = arith.constant 0 : index
    %c0_15 = arith.constant 0 : index
    %c0_16 = arith.constant 0 : index
    %29 = vector.load %arg5[%c0_14, %c0_15, %c0_16] : memref<1x16x16xf32, #tpu.memory_space<vmem>>, vector<1x16x16xf32>
    %30 = vector.shape_cast %29 : vector<1x16x16xf32> to vector<16x16xf32>
    %31 = vector.shape_cast %28 : vector<16x16xf32> to vector<1x16x16xf32>
    tpu.vector_store %arg5[%c0_14, %c0_15, %c0_16], %31 {strides = array<i32>} : memref<1x16x16xf32, #tpu.memory_space<vmem>>, vector<1x16x16xf32>,
    return
  }
  func.func @transform_0(%arg0: i32) -> (i32, i32, i32) {
    %c0_i32 = arith.constant 0 : i32
    %c0_i32_0 = arith.constant 0 : i32
    %c0_i32_1 = arith.constant 0 : i32
    return %arg0, %c0_i32, %c0_i32_0 : i32, i32, i32
  }
  func.func @transform_1(%arg0: i32) -> (i32, i32) {
    %c0_i32 = arith.constant 0 : i32
    %c0_i32_0 = arith.constant 0 : i32
    %c0_i32_1 = arith.constant 0 : i32
    return %c0_i32, %c0_i32_0 : i32, i32
  }
  func.func @transform_2(%arg0: i32) -> (i32, i32) {
    %c0_i32 = arith.constant 0 : i32
    %c0_i32_0 = arith.constant 0 : i32
    %c0_i32_1 = arith.constant 0 : i32
    return %c0_i32, %c0_i32_0 : i32, i32
  }
  func.func @transform_3(%arg0: i32) -> (i32, i32) {
    %c0_i32 = arith.constant 0 : i32
    %c0_i32_0 = arith.constant 0 : i32
    %c0_i32_1 = arith.constant 0 : i32
    return %c0_i32, %c0_i32_0 : i32, i32
  }
  func.func @transform_4(%arg0: i32) -> (i32, i32, i32) {
    %c0_i32 = arith.constant 0 : i32
    %c0_i32_0 = arith.constant 0 : i32
    %c0_i32_1 = arith.constant 0 : i32
    return %arg0, %c0_i32, %c0_i32_0 : i32, i32, i32
  }
}

module attributes {stable_mosaic.version = 11 : i64} {
  func.func @_bin_loss_kernel(%arg0: i32, %arg1: memref<4x256xf32, #tpu.memory_space<vmem>>, %arg2: memref<256x128xf32, #tpu.memory_space<vmem>>, %arg3: memref<1x1xf32, #tpu.memory_space<vmem>>, %arg4: memref<4x128xf32, #tpu.memory_space<vmem>>) attributes {dimension_semantics = [#tpu.dimension_semantics<arbitrary>], iteration_bounds = array<i64: 1>, scalar_prefetch = 0 : i64, scratch_operands = 1 : i64, tpu.core_type = #tpu.core_type<tc>, window_params = [{transform_indices = @transform_0, window_bounds = array<i64: 4, 256>}, {transform_indices = @transform_1, window_bounds = array<i64: 256, 128>}, {pipeline_mode = #tpu.pipeline_mode<synchronous>, transform_indices = @transform_2, window_bounds = array<i64: 1, 1>}]} {
    %c0_i32 = arith.constant 0 : i32
    %0 = arith.cmpi eq, %arg0, %c0_i32 : i32
    %1 = arith.extui %0 : i1 to i32
    %c0_i32_0 = arith.constant 0 : i32
    %2 = arith.cmpi ne, %1, %c0_i32_0 : i32
    scf.if %2 {
      %cst_10 = arith.constant 0.000000e+00 : f32
      %12 = vector.broadcast %cst_10 : f32 to vector<4x128xf32>
      %c0_11 = arith.constant 0 : index
      %c0_12 = arith.constant 0 : index
      %13 = vector.load %arg4[%c0_11, %c0_12] : memref<4x128xf32, #tpu.memory_space<vmem>>, vector<4x128xf32>
      tpu.vector_store %arg4[%c0_11, %c0_12], %12 {strides = array<i32>} : memref<4x128xf32, #tpu.memory_space<vmem>>, vector<4x128xf32>,
    } else {
    }
    %c0 = arith.constant 0 : index
    %c0_1 = arith.constant 0 : index
    %3 = vector.load %arg4[%c0, %c0_1] : memref<4x128xf32, #tpu.memory_space<vmem>>, vector<4x128xf32>
    %c0_2 = arith.constant 0 : index
    %c0_3 = arith.constant 0 : index
    %4 = vector.load %arg1[%c0_2, %c0_3] : memref<4x256xf32, #tpu.memory_space<vmem>>, vector<4x256xf32>
    %c0_4 = arith.constant 0 : index
    %c0_5 = arith.constant 0 : index
    %5 = vector.load %arg2[%c0_4, %c0_5] : memref<256x128xf32, #tpu.memory_space<vmem>>, vector<256x128xf32>
    %cst = arith.constant dense<0.000000e+00> : vector<4x128xf32>
    %6 = tpu.matmul %4, %5, %cst {dimension_numbers = #tpu.dot_dimension_numbers<[1], [0], [0], [1], [0, 0, 1, 1], [], []>} : vector<4x256xf32>, vector<256x128xf32>, vector<4x128xf32> -> vector<4x128xf32>
    %7 = arith.addf %3, %6 : vector<4x128xf32>
    %c0_6 = arith.constant 0 : index
    %c0_7 = arith.constant 0 : index
    %8 = vector.load %arg4[%c0_6, %c0_7] : memref<4x128xf32, #tpu.memory_space<vmem>>, vector<4x128xf32>
    tpu.vector_store %arg4[%c0_6, %c0_7], %7 {strides = array<i32>} : memref<4x128xf32, #tpu.memory_space<vmem>>, vector<4x128xf32>,
    %c0_i32_8 = arith.constant 0 : i32
    %9 = arith.cmpi eq, %arg0, %c0_i32_8 : i32
    %10 = arith.extui %9 : i1 to i32
    %c0_i32_9 = arith.constant 0 : i32
    %11 = arith.cmpi ne, %10, %c0_i32_9 : i32
    scf.if %11 {
      %c0_10 = arith.constant 0 : index
      %c0_11 = arith.constant 0 : index
      %12 = vector.load %arg4[%c0_10, %c0_11] : memref<4x128xf32, #tpu.memory_space<vmem>>, vector<4x128xf32>
      %13 = tpu.iota {dimensions = array<i32: 1>} : vector<4x128xi32>
      %c15_i32 = arith.constant 15 : i32
      %14 = vector.broadcast %c15_i32 : i32 to vector<4x128xi32>
      %15 = arith.cmpi slt, %13, %14 : vector<4x128xi32>
      %cst_12 = arith.constant 0x7F800000 : f32
      %16 = vector.broadcast %cst_12 : f32 to vector<4x128xf32>
      %17 = arith.select %15, %12, %16 : vector<4x128xi1>, vector<4x128xf32>
      %cst_13 = arith.constant dense<0x7F800000> : vector<4xf32>
      %18 = vector.multi_reduction <minimumf>, %17, %cst_13 [1] : vector<4x128xf32> to vector<4xf32>
      %19 = vector.shape_cast %18 : vector<4xf32> to vector<4x1xf32>
      %cst_14 = arith.constant 0xFF800000 : f32
      %20 = vector.broadcast %cst_14 : f32 to vector<4x128xf32>
      %21 = arith.select %15, %12, %20 : vector<4x128xi1>, vector<4x128xf32>
      %cst_15 = arith.constant dense<0xFF800000> : vector<4xf32>
      %22 = vector.multi_reduction <maximumf>, %21, %cst_15 [1] : vector<4x128xf32> to vector<4xf32>
      %23 = vector.shape_cast %22 : vector<4xf32> to vector<4x1xf32>
      %24 = vector.broadcast %19 : vector<4x1xf32> to vector<4x128xf32>
      %25 = arith.subf %12, %24 : vector<4x128xf32>
      %26 = arith.subf %23, %19 : vector<4x1xf32>
      %27 = vector.broadcast %26 : vector<4x1xf32> to vector<4x128xf32>
      %28 = arith.divf %25, %27 : vector<4x128xf32>
      %29 = vector.extract_strided_slice %28 {offsets = [0, 0], sizes = [2, 128], strides = [1, 1]} : vector<4x128xf32> to vector<2x128xf32>
      %30 = vector.extract_strided_slice %28 {offsets = [2, 0], sizes = [2, 128], strides = [1, 1]} : vector<4x128xf32> to vector<2x128xf32>
      %31 = arith.subf %29, %30 : vector<2x128xf32>
      %32 = vector.extract_strided_slice %15 {offsets = [0, 0], sizes = [2, 128], strides = [1, 1]} : vector<4x128xi1> to vector<2x128xi1>
      %cst_16 = arith.constant 0.000000e+00 : f32
      %33 = vector.broadcast %cst_16 : f32 to vector<2x128xf32>
      %34 = arith.select %32, %31, %33 : vector<2x128xi1>, vector<2x128xf32>
      %35 = arith.mulf %34, %34 : vector<2x128xf32>
      %36 = vector.shape_cast %35 : vector<2x128xf32> to vector<1x2x128xf32>
      %cst_17 = arith.constant dense<0.000000e+00> : vector<1xf32>
      %37 = vector.multi_reduction <add>, %36, %cst_17 [1, 2] : vector<1x2x128xf32> to vector<1xf32>
      %38 = vector.shape_cast %37 : vector<1xf32> to vector<1x1x1xf32>
      %39 = vector.extract %38[0, 0, 0] : f32 from vector<1x1x1xf32>
      %40 = vector.broadcast %39 : f32 to vector<1x1xf32>
      %cst_18 = arith.constant 0.0333333351 : f32
      %41 = vector.broadcast %cst_18 : f32 to vector<1x1xf32>
      %42 = arith.mulf %40, %41 : vector<1x1xf32>
      %c0_19 = arith.constant 0 : index
      %c0_20 = arith.constant 0 : index
      %43 = vector.load %arg3[%c0_19, %c0_20] : memref<1x1xf32, #tpu.memory_space<vmem>>, vector<1x1xf32>
      tpu.vector_store %arg3[%c0_19, %c0_20], %42 {strides = array<i32>} : memref<1x1xf32, #tpu.memory_space<vmem>>, vector<1x1xf32>,
    } else {
    }
    return
  }
  func.func @transform_0(%arg0: i32) -> (i32, i32) {
    %c0_i32 = arith.constant 0 : i32
    %c0_i32_0 = arith.constant 0 : i32
    return %c0_i32, %arg0 : i32, i32
  }
  func.func @transform_1(%arg0: i32) -> (i32, i32) {
    %c0_i32 = arith.constant 0 : i32
    %c0_i32_0 = arith.constant 0 : i32
    return %arg0, %c0_i32 : i32, i32
  }
  func.func @transform_2(%arg0: i32) -> (i32, i32) {
    %c0_i32 = arith.constant 0 : i32
    %c0_i32_0 = arith.constant 0 : i32
    %c0_i32_1 = arith.constant 0 : i32
    return %c0_i32, %c0_i32_0 : i32, i32
  }
}

</mosaic_0001>

<bundles_post_ra>
// kernel: fn.2
= control target key start
LH: loop header
LB: loop body
LE: loop exit
PB: predicated region body
PF: predicated region fallthrough
CT: control target
= control target key end

     0   :  { %s590_s15 = smov 0   ;;  %s634_s0 = inlined_call_operand.vmem [shape: f32[4,16,16], index: 0, kind: input, shape index: {}]   ;;  %s635_s1 = inlined_call_operand.vmem [shape: bf16[32,16], index: 1, kind: input, shape index: {}]   ;;  %s636_s2 = inlined_call_operand.vmem [shape: bf16[16,16], index: 2, kind: input, shape index: {}]   ;;  %s637_s3 = inlined_call_operand.vmem [shape: bf16[16,16], index: 3, kind: input, shape index: {}]   ;;  %s638_s4 = inlined_call_operand.vmem [shape: f32[4,16,16], index: 4, kind: output, shape index: {}]  }
   0x1 LB: > { %s487_s16 = sadd.s32 4294967295, %s563_s15   ;;  %p491_p0 = scmp.ge.s32.totalorder %s563_s15, 1  ;;  %s563_s15 = sphi %s590_s15, %s14_s15  }
   0x2   : > { %p162_p1 = scmp.lt.s32.totalorder %s563_s15, 5 }
   0x4   : > { %p163_p2 = pnand %p491_p0, %p162_p1 }
   0x5   : > { %p188_p3 = scmp.lt.s32.totalorder (!%p163_p2), %s487_s16, 3  ;;  %v545_v0 = vld [vmem:[%s635_s1] sm:$0xff] (!%p163_p2)   ;;  %vm216_vm0 = vcmask (!%p163_p2), 130048   ;;  %v546_v5 = vld [vmem:[%s635_s1 + $0x8] sm:$0xff] (!%p163_p2)  }
   0x6   : > { %166 = sbr.rel (%p163_p2) target bundleno = 497 (0x1f1), region = 36  ;;  %521 = vmatprep.mubr.msk.bf16.mxu0 (!%p163_p2), %vm216_vm0, %v545_v0  ;;  %v547_v4 = vld [vmem:[%s637_s3] sm:$0xff] (!%p163_p2)  }
   0x7   : > { %v548_v6 = vld [vmem:[%s636_s2] sm:$0xff] (!%p163_p2)  }
   0x8   : > { %525 = vmatprep.subr.bf16.mxu1 (!%p163_p2), %v548_v6 }
   0x9   : > { %526 = vmatpush3.bf16.msra.mxu1 (!%p163_p2), %v548_v6 }
   0xd   : > { %s640_s16 = smov (!%p188_p3, %s487_s16), 3 }
   0xe   : > { %s508_s19 = sshll.u32 %s640_s16, 4 }
   0xf   : > { %s192_s22 = scalar_lea.vmem %s634_s0, %s508_s19  ;;  %s197_s5 = scalar_lea.vmem %s638_s4, %s508_s19 }
  0x10   : > { %v199_v1 = vld [vmem:[%s192_s22] sm:$0xff]  ;;  %v200_v2 = vld [vmem:[%s192_s22 + $0x8] sm:$0xff] }
  0x11   : > { %v201_v3 = vpack.c.bf16 %v200_v2, %v199_v1 }
  0x13   : > { %519 = vmatprep.subr.bf16.mxu0 %v201_v3 }
  0x14   : > { %520 = vmatpush3.bf16.msra.mxu0 %v201_v3 }
  0x15   : > { %531 = vmatprep.subr.bf16.mxu0 %v547_v4 }
  0x17   : > { %522 = vmatmul.mubr.msk.bf16.vlgmr.msra.gmra.mrb[0].mxu0 %vm216_vm0, %v546_v5 }
  0x18   : > { %532 = vmatpush3.bf16.msra.mxu0 %v547_v4 }
  0xea   : > { %v523_v7 = vpop.f32.mrb[0].mxu0 }
  0xeb   : > { %v257_v8 = vpop.f32.mrb[1].mxu0 }
  0xec   : > { %v524_v9 = vpop.f32.mrb[2].mxu0 }
  0xed   : > { %v273_v10 = vpack.c.bf16 %v524_v9, %v523_v7  ;;  %v260_v11 = vpop.f32.mrb[3].mxu0 }
  0xee   : > { %v272_v12 = vpack.c.bf16 %v260_v11, %v257_v8 }
  0xf0   : > { %527 = vmatprep.mubr.msk.bf16.mxu1 %vm216_vm0, %v272_v12  ;;  %533 = vmatprep.mubr.msk.bf16.mxu0 %vm216_vm0, %v272_v12 }
  0xf1   : > { %528 = vmatmul.mubr.msk.bf16.vlgmr.msra.gmra.mrb[0].mxu1 %vm216_vm0, %v273_v10  ;;  %534 = vmatmul.mubr.msk.bf16.vlgmr.msra.gmra.mrb[4].mxu0 %vm216_vm0, %v273_v10 }
 0x1c4   : > { %v529_v13 = vpop.f32.mrb[0].mxu1  ;;  %v535_v14 = vpop.f32.mrb[4].mxu0 }
 0x1c5   : > { %v322_v15 = vpop.f32.mrb[1].mxu1  ;;  %v379_v16 = vpop.f32.mrb[5].mxu0 }
 0x1c6   : > { %v394_v17 = vsub.f32 %v322_v15, %v535_v14  ;;  %v398_v18 = vadd.f32 %v529_v13, %v379_v16  ;;  %v530_v19 = vpop.f32.mrb[2].mxu1  ;;  %v536_v20 = vpop.f32.mrb[6].mxu0 }
 0x1c7   : > { %v325_v21 = vpop.f32.mrb[3].mxu1  ;;  %v382_v22 = vpop.f32.mrb[7].mxu0 }
 0x1c8   : > { %v396_v23 = vadd.f32 1e-08, %v394_v17  ;;  %v400_v24 = vsub.f32 0.0, %v398_v18  ;;  %v395_v25 = vsub.f32 %v325_v21, %v536_v20  ;;  %v399_v26 = vadd.f32 %v530_v19, %v382_v22 }
 0x1ca   : > { %v402_v27 = vadd.f32 1e-08, %v400_v24  ;;  %v401_v28 = vsub.f32 0.0, %v399_v26  ;;  %v397_v29 = vadd.f32 1e-08, %v395_v25  ;;  %v404_v30 = vmul.f32 %v396_v23, %v396_v23 }
 0x1cc   : > { %v406_v31 = vmul.f32 %v402_v27, %v402_v27  ;;  %v403_v32 = vadd.f32 1e-08, %v401_v28  ;;  %v405_v35 = vmul.f32 %v397_v29, %v397_v29 }
 0x1ce   : > { %v408_v33 = vadd.f32 %v406_v31, %v404_v30  ;;  %v407_v34 = vmul.f32 %v403_v32, %v403_v32 }
 0x1d0   : > { %549 = vrsqrt.f32 %v408_v33  ;;  %v409_v36 = vadd.f32 %v407_v34, %v405_v35  ;;  %vm412_vm1 = vcmp.eq.f32.partialorder %v408_v33, inf  ;;  %v415_v39 = vand.u32 2147483648, %v408_v33 }
 0x1d1   : > { %vm414_vm2 = vcmp.eq.f32.partialorder %v408_v33, 0.0 }
 0x1d2   : > { %551 = vrsqrt.f32 %v409_v36  ;;  %vm419_vm3 = vcmp.eq.f32.partialorder %v409_v36, inf  ;;  %v422_v45 = vand.u32 2147483648, %v409_v36  ;;  %vm421_vm4 = vcmp.eq.f32.partialorder %v409_v36, 0.0 }
 0x1da   : > { %v550_v37 = vpop.eup %549 }
 0x1db   : > { %v411_v38 = vmul.f32 %v550_v37, %v408_v33 }
 0x1dc   : > { %v552_v40 = vpop.eup %551 }
 0x1dd   : > { %v413_v41 = vsel %vm412_vm1, %v408_v33, %v411_v38  ;;  %v418_v43 = vmul.f32 %v552_v40, %v409_v36 }
 0x1de   : > { %v416_v42 = vsel %vm414_vm2, %v415_v39, %v413_v41 }
 0x1df   : > { %v424_v44 = vadd.f32 1e-08, %v416_v42  ;;  %v420_v46 = vsel %vm419_vm3, %v409_v36, %v418_v43 }
 0x1e0   : > { %v423_v47 = vsel %vm421_vm4, %v422_v45, %v420_v46 }
 0x1e1   : > { %553 = vlog2.f32 %v424_v44  ;;  %v425_v48 = vadd.f32 1e-08, %v423_v47 }
 0x1e3   : > { %555 = vlog2.f32 %v425_v48 }
 0x1eb   : > { %v554_v49 = vpop.eup %553 }
 0x1ec   : > { %v427_v50 = vmul.f32 0.6931472, %v554_v49 }
 0x1ed   : > { %v556_v51 = vpop.eup %555 }
 0x1ee   : > { %430 = vst.msk [vmem:[%s197_s5] sm:$0xff] %vm216_vm0, %v427_v50  ;;  %v429_v52 = vmul.f32 0.6931472, %v556_v51 }
 0x1f0   : > { %431 = vst.msk [vmem:[%s197_s5 + $0x8] sm:$0xff] %vm216_vm0, %v429_v52 }
 0x1f1 PF: > { %s14_s15 = sadd.s32 1, %s563_s15  }
 0x1f2   : > { %p11_p4 = scmp.ge.s32.totalorder %s14_s15, 6  }
 0x1f4   :  { %13 = sbr.rel (!%p11_p4) target bundleno = 1 (0x1), region = 66 }

// kernel: fn.3
= control target key start
LH: loop header
LB: loop body
LE: loop exit
PB: predicated region body
PF: predicated region fallthrough
CT: control target
= control target key end

     0   :  { %s410_s0 = inlined_call_operand.vmem [shape: f32[4,256], index: 0, kind: input, shape index: {}]   ;;  %s411_s1 = inlined_call_operand.vmem [shape: f32[256,128], index: 1, kind: input, shape index: {}]   ;;  %s412_s2 = inlined_call_operand.hbm [shape: f32[1,1], index: 2, kind: output, shape index: {}]  }
   0x1   :  { %v35_v0 = vld [vmem:[%s411_s1 + $0x80] sm:$0xff]  ;;  %v36_v1 = vld [vmem:[%s411_s1 + $0x88] sm:$0xff]  ;;  %v37_v5 = vld [vmem:[%s411_s1 + $0x90] sm:$0xff] }
   0x2   :  { %v19_v2 = vld [vmem:[%s411_s1] sm:$0xff]  ;;  %v216_v3 = vpack.c.bf16 %v36_v1, %v35_v0  ;;  %v20_v4 = vld [vmem:[%s411_s1 + $0x8] sm:$0xff]  ;;  %v38_v6 = vld [vmem:[%s411_s1 + $0x98] sm:$0xff] }
   0x3   :  { %v218_v7 = vpack.c.bf16 %v20_v4, %v19_v2  ;;  %v220_v8 = vpack.c.bf16 %v38_v6, %v37_v5  ;;  %v21_v9 = vld [vmem:[%s411_s1 + $0x10] sm:$0xff]  ;;  %v22_v10 = vld [vmem:[%s411_s1 + $0x18] sm:$0xff]  ;;  %v39_v11 = vld [vmem:[%s411_s1 + $0xa0] sm:$0xff] }
   0x4   :  { %217 = vmatprep.subr.bf16.mxu0 %v216_v3  ;;  %v40_v12 = vld [vmem:[%s411_s1 + $0xa8] sm:$0xff]  ;;  %v222_v13 = vpack.c.bf16 %v22_v10, %v21_v9  ;;  %v23_v15 = vld [vmem:[%s411_s1 + $0x20] sm:$0xff]  ;;  %v41_v17 = vld [vmem:[%s411_s1 + $0xb0] sm:$0xff] }
   0x5   :  { %219 = vmatpush3.bf16.msra.mxu0 %v218_v7  ;;  %v224_v14 = vpack.c.bf16 %v40_v12, %v39_v11  ;;  %v24_v16 = vld [vmem:[%s411_s1 + $0x28] sm:$0xff]  ;;  %v42_v18 = vld [vmem:[%s411_s1 + $0xb8] sm:$0xff]  ;;  %v25_v21 = vld [vmem:[%s411_s1 + $0x30] sm:$0xff] }
   0x6   :  { %221 = vmatprep.subr.bf16.mxu0 %v220_v8  ;;  %v226_v19 = vpack.c.bf16 %v24_v16, %v23_v15  ;;  %v228_v20 = vpack.c.bf16 %v42_v18, %v41_v17  ;;  %v26_v22 = vld [vmem:[%s411_s1 + $0x38] sm:$0xff]  ;;  %v43_v23 = vld [vmem:[%s411_s1 + $0xc0] sm:$0xff]  ;;  %v44_v24 = vld [vmem:[%s411_s1 + $0xc8] sm:$0xff] }
   0x7   :  { %v18_v25 = vld [vmem:[%s410_s0] sm:$0xff] }
   0x8   :  { %v52_v26 = vcombine.high %v18_v25, %v18_v25 }
   0x9   :  { %223 = vmatpush3.bf16.msra.mxu0 %v222_v13 }
   0xa   :  { %225 = vmatprep.subr.bf16.mxu0 %v224_v14 }
   0xb   :  { %7 = vsyncpa [#allocation4], 0  ;;  %v230_v27 = vpack.c.bf16 %v26_v22, %v25_v21  ;;  %v232_v28 = vpack.c.bf16 %v44_v24, %v43_v23  ;;  %v27_v29 = vld [vmem:[%s411_s1 + $0x40] sm:$0xff]  ;;  %v28_v30 = vld [vmem:[%s411_s1 + $0x48] sm:$0xff]  ;;  %118 = vmatprep.mubr.f32.mxu0 %v52_v26  ;;  %v279_v50 = vmov 0.0   ;;  %v130_v55 = vlaneseq }
   0xc   :  { %v45_v31 = vld [vmem:[%s411_s1 + $0xd0] sm:$0xff]  ;;  %v46_v32 = vld [vmem:[%s411_s1 + $0xd8] sm:$0xff]  ;;  %v234_v33 = vpack.c.bf16 %v28_v30, %v27_v29  ;;  %v47_v37 = vld [vmem:[%s411_s1 + $0xe0] sm:$0xff]  ;;  %16 = vst [vmem:[#allocation2] sm:$0xf] %v279_v50  ;;  %vm134_vm1 = vcmask 1043456  }
   0xd   :  { %227 = vmatpush3.bf16.msra.mxu0 %v226_v19  ;;  %v236_v34 = vpack.c.bf16 %v46_v32, %v45_v31  ;;  %v29_v35 = vld [vmem:[%s411_s1 + $0x50] sm:$0xff]  ;;  %v30_v36 = vld [vmem:[%s411_s1 + $0x58] sm:$0xff]  ;;  %v48_v38 = vld [vmem:[%s411_s1 + $0xe8] sm:$0xff]  ;;  %v131_v57 = vand.u32 127, %v130_v55  ;;  %vm152_vm2 = vcmask 1041408   ;;  %vm165_vm3 = vcmask 0  }
   0xe   :  { %229 = vmatprep.subr.bf16.mxu0 %v228_v20  ;;  %v238_v39 = vpack.c.bf16 %v30_v36, %v29_v35  ;;  %v240_v40 = vpack.c.bf16 %v48_v38, %v47_v37  ;;  %v31_v41 = vld [vmem:[%s411_s1 + $0x60] sm:$0xff]  ;;  %v32_v42 = vld [vmem:[%s411_s1 + $0x68] sm:$0xff]  ;;  %v49_v43 = vld [vmem:[%s411_s1 + $0xf0] sm:$0xff] }
   0xf   :  { %v50_v44 = vld [vmem:[%s411_s1 + $0xf8] sm:$0xff]  ;;  %v242_v45 = vpack.c.bf16 %v32_v42, %v31_v41  ;;  %v33_v47 = vld [vmem:[%s411_s1 + $0x70] sm:$0xff]  ;;  %vm132_vm0 = vcmp.lt.s32.totalorder %v131_v57, 15 }
  0x10   :  { %v244_v46 = vpack.c.bf16 %v50_v44, %v49_v43  ;;  %v34_v48 = vld [vmem:[%s411_s1 + $0x78] sm:$0xff]  ;;  %s280_s1 = smov [#allocation3]  }
  0x11   :  { %231 = vmatpush3.bf16.msra.mxu0 %v230_v27  ;;  %v246_v49 = vpack.c.bf16 %v34_v48, %v33_v47  ;;  %s173_s18 = sshll.u32 %s280_s1, 4  ;;  %s174_s18 = int_to_ptr.vmem [resolvable:$true] %s173_s18 }
  0x12   :  { %233 = vmatprep.subr.bf16.mxu0 %v232_v28  ;;  %s255_s20 = scalar_lea.vmem %s174_s18, 16  ;;  %s259_s21 = scalar_lea.vmem %s174_s18, 32 }
  0x13   :  { %v17_v52 = vld [vmem:[#allocation2] sm:$0xf]  ;;  %p256_p0 = scmp.ne.s32.totalorder %s174_s18, %s255_s20  ;;  %p260_p1 = scmp.lt.s32.totalorder %s174_s18, %s174_s18 }
  0x14   :  { %p261_p2 = scmp.lt.s32.totalorder %s259_s21, %s255_s20 }
  0x15   :  { %235 = vmatpush3.bf16.msra.mxu0 %v234_v33 }
  0x16   :  { %237 = vmatprep.subr.bf16.mxu0 %v236_v34  ;;  %p262_p3 = por %p261_p2, %p260_p1 }
  0x18   :  { %p263_p4 = pnand %p262_p3, %p256_p0 }
  0x19   :  { %239 = vmatpush3.bf16.msra.mxu0 %v238_v39 }
  0x1a   :  { %241 = vmatprep.subr.bf16.mxu0 %v240_v40 }
  0x1d   :  { %243 = vmatpush3.bf16.msra.mxu0 %v242_v45 }
  0x1e   :  { %245 = vmatprep.subr.bf16.mxu0 %v244_v46 }
  0x21   :  { %247 = vmatpush3.bf16.msra.mxu0 %v246_v49 }
  0x24   :  { %119 = vmatmul.mubr.f32.vlgmr.msra.gmra.mrb[0].mxu0 %v18_v25 }
  0xf7   :  { %v213_v51 = vpop.f32.mrb[0].mxu0 }
  0xf8   :  { %v214_v53 = vpop.f32.mrb[1].mxu0 }
  0xf9   :  { %v215_v54 = vadd.f32 %v214_v53, %v213_v51 }
  0xfb   :  { %v124_v56 = vadd.f32 %v215_v54, %v17_v52 }
  0xfd   :  { %125 = vst [vmem:[#allocation2] sm:$0xf] %v124_v56 }
 0x104   :  { %v129_v58 = vld [vmem:[#allocation2] sm:$0xf] }
 0x105   :  { %v133_v59 = vsel %vm132_vm0, %v129_v58, inf  ;;  %v138_v61 = vsel %vm132_vm0, %v129_v58, -inf }
 0x106   :  { %v135_v60 = vsel %vm134_vm1, %v133_v59, inf  ;;  %v139_v62 = vsel %vm134_vm1, %v138_v61, -inf }
 0x107   :  { %136 = vmin.xlane.f32.xlu0 %v135_v60 }
 0x10b   :  { %140 = vmax.xlane.f32.xlu0 %v139_v62 }
 0x194   :  { %v137_v63 = vpop.xlane.xlu0 %136 }
 0x195   :  { %v142_v2 = vsub.f32 %v129_v58, %v137_v63 }
 0x198   :  { %v141_v0 = vpop.xlane.xlu0 %140 }
 0x199   :  { %v143_v1 = vsub.f32 %v141_v0, %v137_v63 }
 0x19b   :  { %253 = vrcp.f32 %v143_v1 }
 0x1a5   :  { %v254_v3 = vpop.eup %253 }
 0x1a6   :  { %v145_v4 = vmul.f32 %v254_v3, %v142_v2 }
 0x1a8   :  { %v147_v5 = vrot.slane %v145_v4, 2 }
 0x1aa   :  { %v149_v6 = vsub.f32 %v145_v4, %v147_v5 }
 0x1ac   :  { %v150_v7 = vsel %vm132_vm0, %v149_v6, 0.0 }
 0x1ad   :  { %v151_v8 = vmul.f32 %v150_v7, %v150_v7 }
 0x1af   :  { %v153_v9 = vsel %vm152_vm2, %v151_v8, 0.0 }
 0x1b0   :  { %154 = vadd.xlane.f32.xlu1 %v153_v9 }
 0x23d   :  { %v155_v10 = vpop.xlane.xlu1 %154 }
 0x23e   :  { %v156_v11 = vrot.slane %v155_v10, 4 }
 0x240   :  { %v157_v12 = vadd.f32 %v156_v11, %v155_v10 }
 0x242   :  { %v158_v13 = vrot.slane %v157_v12, 2 }
 0x244   :  { %v159_v14 = vadd.f32 %v158_v13, %v157_v12 }
 0x246   :  { %v160_v15 = vrot.slane %v159_v14, 1 }
 0x248   :  { %v161_v16 = vadd.f32 %v160_v15, %v159_v14 }
 0x24a   :  { %248 = vpush %v161_v16 }
 0x27b   :  { %s249_s19 = spop %248 }
 0x27c   :  { %v163_v17 = vstv %s249_s19 }
 0x27d   :  { %v164_v18 = vmul.f32 0.033333335, %v163_v17 }
 0x27f   :  { %166 = vst.msk [vmem:[#allocation3] sm:$0x1] %vm165_vm3, %v164_v18 }
 0x280   :  { %266 = shalt.err (!%p263_p4)
}
 0x281   :  { %s267_s24 = scalar_lea.hbm %s412_s2, 16 }
 0x282   :  { %p268_p5 = scmp.ne.s32.totalorder %s412_s2, %s267_s24  ;;  %p271_p6 = scmp.lt.u32.totalorder %s267_s24, %s412_s2 }
 0x284   :  { %p273_p7 = pnand %p271_p6, %p268_p5 }
 0x286   :  { %276 = shalt.err (!%p273_p7)
}
 0x287   :  { %176 = dma.vmem_to_hbm [thread:$0]  %s174_s18, 16, %s412_s2, [#allocation4]  }
 0x288   :  { %277 = dma.done.wait [#allocation4], 16  }
 0x289   :  { %278 = vsyncadd [#allocation4], 4294967280 }
 0x28a   :  { %180 = vsyncpa [#allocation4], 1 }

</bundles_post_ra>
